<compile_context>
chip_gen: v5e
topology: v5e:2x2
jax: 0.10.0
libtpu: 0.0.40
codegen_flags: <defaults>
</compile_context>

<pallas_src>
import functools

import jax
import jax.numpy as jnp
from jax.experimental import pallas as pl
from jax.experimental.pallas import tpu as pltpu

# ----- synthetic hyper-parameters (mirror TextCNN.__init__) -------------------
VOCAB_NUM = 50
TRAIN_DIM = 16            # train_embedding_word_dim
PRE_DIM = 16              # vocab.word_dim (pretrained vectors)
USING_PRETRAINED = True
WORD_DIM = TRAIN_DIM + (PRE_DIM if USING_PRETRAINED else 0)   # conv in_channels
NUM_CHANNELS = [8, 8, 8]
KERNEL_SIZES = [3, 4, 5]
LABELS = 4
LANE_PAD = 128            # lane-dense channel / logits width (sliced outside)
VPAD = 128                # vocab padded to a full MXU K tile


# ----- Pallas kernel -----------------------------------------------------------
def _textcnn_kernel(tb, seq_len, k_max,
                    ids_ref, table_ref, wconv_ref, bconv_ref, maxpos_ref,
                    fcw_ref, fcb_ref, out_ref):
    """Embedding gather + fused Conv1d(x3) + ReLU + MaxPool + Linear, one batch tile.

    ids_ref    : (TB*L, 1)        int32   token ids of this batch tile
    table_ref  : (128, D)         f32     [train | pretrained] table, vocab zero-padded
    wconv_ref  : (kmax*D, 128)    f32     all conv weights fused (tap-major, zero-padded)
    bconv_ref  : (1, 128)         f32     conv biases in their channel columns
    maxpos_ref : (1, 128)         int32   last valid conv position per channel column
    fcw_ref    : (128, 128)       f32     fc weight, transposed + zero-padded
    fcb_ref    : (1, 128)         f32
    out_ref    : (TB, 128)        f32     lane-dense logits slab
    """
    bl = tb * seq_len
    d = table_ref.shape[1]

    # 1) Embedding gather: one-hot(ids) @ table, one full (bl,128)x(128,D) MXU pass.
    ids = ids_ref[...]                                               # (bl, 1)
    onehot = (ids == jax.lax.broadcasted_iota(jnp.int32, (bl, VPAD), 1)
              ).astype(jnp.float32)                                  # (bl, 128)
    emb = jnp.dot(onehot, table_ref[...],
                  preferred_element_type=jnp.float32)                # (bl, D)

    # TODO(synk): nn.Dropout(0.5) on embeddings/features is identity in eval mode.

    # 2) All convs as ONE im2col matmul.  Tail windows that run past the tile are
    #    filled with zeros and masked out per-column in the pooling step below.
    zpad = jnp.zeros((k_max - 1, d), jnp.float32)
    emb_pad = jnp.concatenate([emb, zpad], axis=0)                   # (bl+kmax-1, D)
    lhs = jnp.concatenate([emb_pad[j:j + bl, :] for j in range(k_max)],
                          axis=1)                                    # (bl, kmax*D)
    y = jnp.dot(lhs, wconv_ref[...],
                preferred_element_type=jnp.float32)                  # (bl, 128)

    # 3) Vectorized masked max-pool over conv positions (one reduction, no batch loop).
    y3 = y.reshape(tb, seq_len, LANE_PAD)                            # (tb, L, 128)
    pos = jax.lax.broadcasted_iota(jnp.int32, (tb, seq_len, LANE_PAD), 1)
    valid = pos <= maxpos_ref[...].reshape(1, 1, LANE_PAD)           # per-column L-k
    pooled = jnp.max(jnp.where(valid, y3, jnp.float32(-1e30)), axis=1)  # (tb, 128)

    # bias + ReLU after the max: max(relu(x+b)) == relu(max(x)+b) per channel.
    h = jnp.maximum(pooled + bconv_ref[...], 0.0)                    # (tb, 128)

    # 4) FC on the lane-padded features; full 128x128 MXU tile, lane-dense store.
    out_ref[...] = (jnp.dot(h, fcw_ref[...], preferred_element_type=jnp.float32)
                    + fcb_ref[...]).astype(out_ref.dtype)


# ----- wrapper -----------------------------------------------------------------
@jax.jit
def textcnn_forward(x_tokens, params):
    """x_tokens: (B, L) int32 token ids -> (B, LABELS) float32 logits."""
    batch, seq_len = x_tokens.shape
    k_max = max(KERNEL_SIZES)
    assert seq_len >= k_max, "seq_len must be >= max kernel size"

    # --- layout prep (tiny; done once in XLA outside the kernel) ---
    if USING_PRETRAINED:
        table = jnp.concatenate([params["embedding_train"],
                                 params["embedding_pre"]], axis=1)    # (V, D)
    else:
        table = params["embedding_train"]
    vocab_num, word_dim = table.shape
    assert vocab_num <= VPAD
    table_pad = jnp.zeros((VPAD, word_dim), jnp.float32).at[:vocab_num, :].set(table)

    # Fused conv weight (tap-major) / bias / per-column last-valid-position.
    wconv = jnp.zeros((k_max * word_dim, LANE_PAD), jnp.float32)
    bconv = jnp.zeros((1, LANE_PAD), jnp.float32)
    maxpos = jnp.full((1, LANE_PAD), seq_len - 1, jnp.int32)          # pad cols: all 0s
    off = 0
    for i, (c, k) in enumerate(zip(NUM_CHANNELS, KERNEL_SIZES)):
        w = params[f"w{i}"]                                           # (C, D, k)
        wf = jnp.transpose(w, (2, 1, 0)).reshape(k * word_dim, c)     # (k*D, C)
        wconv = wconv.at[:k * word_dim, off:off + c].set(wf)
        bconv = bconv.at[:, off:off + c].set(params[f"b{i}"])
        maxpos = maxpos.at[:, off:off + c].set(seq_len - k)
        off += c
    sum_c = off

    labels = params["fc_w"].shape[0]
    fcw = jnp.zeros((LANE_PAD, LANE_PAD), jnp.float32).at[:sum_c, :labels].set(
        params["fc_w"].T)
    fcb = jnp.zeros((1, LANE_PAD), jnp.float32).at[:, :labels].set(params["fc_b"])

    # --- batch padding + tile selection ---
    b_pad = ((batch + 7) // 8) * 8
    if b_pad <= 8:
        tb = b_pad                      # one big tile (fewest grid steps)
    elif b_pad <= 256:
        # >= 2 parallel steps once batch allows it (feeds both v7x TensorCores);
        # on single-TC v5e/v6e the extra step cost is one ~600-cycle epilogue.
        tb = b_pad // 2 if (b_pad // 2) % 8 == 0 else b_pad
    else:
        tb = next(c for c in (128, 64, 32, 16, 8) if b_pad % c == 0)
    grid = (b_pad // tb,)

    ids = jnp.zeros((b_pad, seq_len), jnp.int32).at[:batch].set(
        x_tokens.astype(jnp.int32)).reshape(b_pad * seq_len, 1)

    kernel = functools.partial(_textcnn_kernel, tb, seq_len, k_max)

    def _full(arr):                     # whole-array (2-D) block, same every step
        return pl.BlockSpec(arr.shape, lambda i: (0, 0))

    in_specs = [
        pl.BlockSpec((tb * seq_len, 1), lambda i: (i, 0)),            # ids (tiled)
        _full(table_pad), _full(wconv), _full(bconv), _full(maxpos),
        _full(fcw), _full(fcb),
    ]

    out = pl.pallas_call(
        kernel,
        out_shape=jax.ShapeDtypeStruct((b_pad, LANE_PAD), jnp.float32),
        grid_spec=pltpu.PrefetchScalarGridSpec(
            num_scalar_prefetch=0,
            grid=grid,
            in_specs=in_specs,
            out_specs=pl.BlockSpec((tb, LANE_PAD), lambda i: (i, 0))),
        compiler_params=pltpu.CompilerParams(
            dimension_semantics=("parallel",),
            vmem_limit_bytes=32 * 1024 * 1024),
    )(ids, table_pad, wconv, bconv, maxpos, fcw, fcb)
    return out[:batch, :labels]


# ----- pure-JAX reference (for correctness check) ------------------------------
def textcnn_ref(x_tokens, params):
    emb_train = jnp.take(params["embedding_train"], x_tokens, axis=0)
    emb_pre = jnp.take(params["embedding_pre"], x_tokens, axis=0)
    emb = jnp.concatenate([emb_train, emb_pre], axis=-1)      # (B, L, D)
    x = jnp.transpose(emb, (0, 2, 1))                         # (B, D, L)  NCW
    feats = []
    for i, _ in enumerate(KERNEL_SIZES):
        w = params[f"w{i}"]                                   # (C, D, k)
        b = params[f"b{i}"]                                   # (1, C)
        y = jax.lax.conv_general_dilated(
            x, w, window_strides=(1,), padding="VALID",
            dimension_numbers=("NCH", "OIH", "NCH"))
        y = jax.nn.relu(y + b.reshape(1, -1, 1))
        feats.append(jnp.max(y, axis=-1))                     # (B, C)
    h = jnp.concatenate(feats, axis=-1)
    return h @ params["fc_w"].T + params["fc_b"]


# ----- main --------------------------------------------------------------------
if __name__ == "__main__":
    key = jax.random.PRNGKey(0)
    keys = jax.random.split(key, 12)
    B, L = 2, 16

    params = {
        "embedding_train": 0.1 * jax.random.normal(keys[0], (VOCAB_NUM, TRAIN_DIM), jnp.float32),
        "embedding_pre":   0.1 * jax.random.normal(keys[1], (VOCAB_NUM, PRE_DIM), jnp.float32),
    }
    for i, (c, k) in enumerate(zip(NUM_CHANNELS, KERNEL_SIZES)):
        params[f"w{i}"] = 0.1 * jax.random.normal(keys[2 + 2 * i], (c, WORD_DIM, k), jnp.float32)
        params[f"b{i}"] = 0.1 * jax.random.normal(keys[3 + 2 * i], (1, c), jnp.float32)
    params["fc_w"] = 0.1 * jax.random.normal(keys[8], (LABELS, sum(NUM_CHANNELS)), jnp.float32)
    params["fc_b"] = 0.1 * jax.random.normal(keys[9], (1, LABELS), jnp.float32)

    x = jax.random.randint(keys[10], (B, L), 0, VOCAB_NUM, dtype=jnp.int32)

    out = jax.block_until_ready(textcnn_forward(x, params))
    ref = textcnn_ref(x, params)

    assert out.shape == (B, LABELS), out.shape
    assert jnp.allclose(out, ref, atol=1e-4, rtol=1e-4), (out, ref)
    print("KERNEL_OK")
</pallas_src>

<mosaic_0001>
module attributes {stable_mosaic.version = 11 : i64} {
  func.func @_textcnn_kernel(%arg0: i32, %arg1: memref<128x1xi32, #tpu.memory_space<vmem>>, %arg2: memref<128x32xf32, #tpu.memory_space<vmem>>, %arg3: memref<160x128xf32, #tpu.memory_space<vmem>>, %arg4: memref<1x128xf32, #tpu.memory_space<vmem>>, %arg5: memref<1x128xi32, #tpu.memory_space<vmem>>, %arg6: memref<128x128xf32, #tpu.memory_space<vmem>>, %arg7: memref<1x128xf32, #tpu.memory_space<vmem>>, %arg8: memref<8x128xf32, #tpu.memory_space<vmem>>) attributes {dimension_semantics = [#tpu.dimension_semantics<parallel>], iteration_bounds = array<i64: 1>, scalar_prefetch = 0 : i64, scratch_operands = 0 : i64, tpu.core_type = #tpu.core_type<tc>, window_params = [{transform_indices = @transform_0, window_bounds = array<i64: 128, 1>}, {pipeline_mode = #tpu.pipeline_mode<synchronous>, transform_indices = @transform_1, window_bounds = array<i64: 128, 32>}, {pipeline_mode = #tpu.pipeline_mode<synchronous>, transform_indices = @transform_2, window_bounds = array<i64: 160, 128>}, {pipeline_mode = #tpu.pipeline_mode<synchronous>, transform_indices = @transform_3, window_bounds = array<i64: 1, 128>}, {pipeline_mode = #tpu.pipeline_mode<synchronous>, transform_indices = @transform_4, window_bounds = array<i64: 1, 128>}, {pipeline_mode = #tpu.pipeline_mode<synchronous>, transform_indices = @transform_5, window_bounds = array<i64: 128, 128>}, {pipeline_mode = #tpu.pipeline_mode<synchronous>, transform_indices = @transform_6, window_bounds = array<i64: 1, 128>}, {transform_indices = @transform_7, window_bounds = array<i64: 8, 128>}]} {
    %c0 = arith.constant 0 : index
    %c0_0 = arith.constant 0 : index
    %0 = vector.load %arg1[%c0, %c0_0] : memref<128x1xi32, #tpu.memory_space<vmem>>, vector<128x1xi32>
    %1 = tpu.iota {dimensions = array<i32: 1>} : vector<128x128xi32>
    %2 = vector.broadcast %0 : vector<128x1xi32> to vector<128x128xi32>
    %3 = arith.cmpi eq, %2, %1 : vector<128x128xi32>
    %4 = arith.extui %3 : vector<128x128xi1> to vector<128x128xi32>
    %5 = arith.sitofp %4 : vector<128x128xi32> to vector<128x128xf32>
    %c0_1 = arith.constant 0 : index
    %c0_2 = arith.constant 0 : index
    %6 = vector.load %arg2[%c0_1, %c0_2] : memref<128x32xf32, #tpu.memory_space<vmem>>, vector<128x32xf32>
    %cst = arith.constant dense<0.000000e+00> : vector<128x32xf32>
    %7 = tpu.matmul %5, %6, %cst {dimension_numbers = #tpu.dot_dimension_numbers<[1], [0], [0], [1], [0, 0, 1, 1], [], []>} : vector<128x128xf32>, vector<128x32xf32>, vector<128x32xf32> -> vector<128x32xf32>
    %cst_3 = arith.constant 0.000000e+00 : f32
    %8 = vector.broadcast %cst_3 : f32 to vector<4x32xf32>
    %9 = tpu.concatenate %7, %8 in 0 : vector<128x32xf32>, vector<4x32xf32> -> vector<132x32xf32>
    %10 = vector.extract_strided_slice %9 {offsets = [0, 0], sizes = [128, 32], strides = [1, 1]} : vector<132x32xf32> to vector<128x32xf32>
    %11 = vector.extract_strided_slice %9 {offsets = [1, 0], sizes = [128, 32], strides = [1, 1]} : vector<132x32xf32> to vector<128x32xf32>
    %12 = vector.extract_strided_slice %9 {offsets = [2, 0], sizes = [128, 32], strides = [1, 1]} : vector<132x32xf32> to vector<128x32xf32>
    %13 = vector.extract_strided_slice %9 {offsets = [3, 0], sizes = [128, 32], strides = [1, 1]} : vector<132x32xf32> to vector<128x32xf32>
    %14 = vector.extract_strided_slice %9 {offsets = [4, 0], sizes = [128, 32], strides = [1, 1]} : vector<132x32xf32> to vector<128x32xf32>
    %15 = tpu.concatenate %10, %11, %12, %13, %14 in 1 : vector<128x32xf32>, vector<128x32xf32>, vector<128x32xf32>, vector<128x32xf32>, vector<128x32xf32> -> vector<128x160xf32>
    %c0_4 = arith.constant 0 : index
    %c0_5 = arith.constant 0 : index
    %16 = vector.load %arg3[%c0_4, %c0_5] : memref<160x128xf32, #tpu.memory_space<vmem>>, vector<160x128xf32>
    %cst_6 = arith.constant dense<0.000000e+00> : vector<128x128xf32>
    %17 = tpu.matmul %15, %16, %cst_6 {dimension_numbers = #tpu.dot_dimension_numbers<[1], [0], [0], [1], [0, 0, 1, 1], [], []>} : vector<128x160xf32>, vector<160x128xf32>, vector<128x128xf32> -> vector<128x128xf32>
    %18 = vector.shape_cast %17 : vector<128x128xf32> to vector<8x16x128xf32>
    %19 = tpu.iota {dimensions = array<i32: 1>} : vector<8x16x128xi32>
    %c0_7 = arith.constant 0 : index
    %c0_8 = arith.constant 0 : index
    %20 = vector.load %arg5[%c0_7, %c0_8] : memref<1x128xi32, #tpu.memory_space<vmem>>, vector<1x128xi32>
    %21 = vector.shape_cast %20 : vector<1x128xi32> to vector<1x1x128xi32>
    %22 = vector.broadcast %21 : vector<1x1x128xi32> to vector<8x16x128xi32>
    %23 = arith.cmpi sle, %19, %22 : vector<8x16x128xi32>
    %cst_9 = arith.constant -1.000000e+30 : f32
    %24 = vector.broadcast %cst_9 : f32 to vector<8x16x128xf32>
    %25 = arith.select %23, %18, %24 : vector<8x16x128xi1>, vector<8x16x128xf32>
    %cst_10 = arith.constant dense<0xFF800000> : vector<8x128xf32>
    %26 = vector.multi_reduction <maximumf>, %25, %cst_10 [1] : vector<8x16x128xf32> to vector<8x128xf32>
    %c0_11 = arith.constant 0 : index
    %c0_12 = arith.constant 0 : index
    %27 = vector.load %arg4[%c0_11, %c0_12] : memref<1x128xf32, #tpu.memory_space<vmem>>, vector<1x128xf32>
    %28 = vector.broadcast %27 : vector<1x128xf32> to vector<8x128xf32>
    %29 = arith.addf %26, %28 : vector<8x128xf32>
    %cst_13 = arith.constant 0.000000e+00 : f32
    %30 = vector.broadcast %cst_13 : f32 to vector<8x128xf32>
    %31 = arith.maximumf %29, %30 : vector<8x128xf32>
    %c0_14 = arith.constant 0 : index
    %c0_15 = arith.constant 0 : index
    %32 = vector.load %arg6[%c0_14, %c0_15] : memref<128x128xf32, #tpu.memory_space<vmem>>, vector<128x128xf32>
    %cst_16 = arith.constant dense<0.000000e+00> : vector<8x128xf32>
    %33 = tpu.matmul %31, %32, %cst_16 {dimension_numbers = #tpu.dot_dimension_numbers<[1], [0], [0], [1], [0, 0, 1, 1], [], []>} : vector<8x128xf32>, vector<128x128xf32>, vector<8x128xf32> -> vector<8x128xf32>
    %c0_17 = arith.constant 0 : index
    %c0_18 = arith.constant 0 : index
    %34 = vector.load %arg7[%c0_17, %c0_18] : memref<1x128xf32, #tpu.memory_space<vmem>>, vector<1x128xf32>
    %35 = vector.broadcast %34 : vector<1x128xf32> to vector<8x128xf32>
    %36 = arith.addf %33, %35 : vector<8x128xf32>
    %c0_19 = arith.constant 0 : index
    %c0_20 = arith.constant 0 : index
    %37 = vector.load %arg8[%c0_19, %c0_20] : memref<8x128xf32, #tpu.memory_space<vmem>>, vector<8x128xf32>
    tpu.vector_store %arg8[%c0_19, %c0_20], %36 {strides = array<i32>} : memref<8x128xf32, #tpu.memory_space<vmem>>, vector<8x128xf32>,
    return
  }
  func.func @transform_0(%arg0: i32) -> (i32, i32) {
    %c0_i32 = arith.constant 0 : i32
    %c0_i32_0 = arith.constant 0 : i32
    return %arg0, %c0_i32 : i32, i32
  }
  func.func @transform_1(%arg0: i32) -> (i32, i32) {
    %c0_i32 = arith.constant 0 : i32
    %c0_i32_0 = arith.constant 0 : i32
    %c0_i32_1 = arith.constant 0 : i32
    return %c0_i32, %c0_i32_0 : i32, i32
  }
  func.func @transform_2(%arg0: i32) -> (i32, i32) {
    %c0_i32 = arith.constant 0 : i32
    %c0_i32_0 = arith.constant 0 : i32
    %c0_i32_1 = arith.constant 0 : i32
    return %c0_i32, %c0_i32_0 : i32, i32
  }
  func.func @transform_3(%arg0: i32) -> (i32, i32) {
    %c0_i32 = arith.constant 0 : i32
    %c0_i32_0 = arith.constant 0 : i32
    %c0_i32_1 = arith.constant 0 : i32
    return %c0_i32, %c0_i32_0 : i32, i32
  }
  func.func @transform_4(%arg0: i32) -> (i32, i32) {
    %c0_i32 = arith.constant 0 : i32
    %c0_i32_0 = arith.constant 0 : i32
    %c0_i32_1 = arith.constant 0 : i32
    return %c0_i32, %c0_i32_0 : i32, i32
  }
  func.func @transform_5(%arg0: i32) -> (i32, i32) {
    %c0_i32 = arith.constant 0 : i32
    %c0_i32_0 = arith.constant 0 : i32
    %c0_i32_1 = arith.constant 0 : i32
    return %c0_i32, %c0_i32_0 : i32, i32
  }
  func.func @transform_6(%arg0: i32) -> (i32, i32) {
    %c0_i32 = arith.constant 0 : i32
    %c0_i32_0 = arith.constant 0 : i32
    %c0_i32_1 = arith.constant 0 : i32
    return %c0_i32, %c0_i32_0 : i32, i32
  }
  func.func @transform_7(%arg0: i32) -> (i32, i32) {
    %c0_i32 = arith.constant 0 : i32
    %c0_i32_0 = arith.constant 0 : i32
    return %arg0, %c0_i32 : i32, i32
  }
}

</mosaic_0001>

<bundles_post_ra>
// kernel: textcnn_forward.1
= control target key start
LH: loop header
LB: loop body
LE: loop exit
PB: predicated region body
PF: predicated region fallthrough
CT: control target
= control target key end

     0   :  { %v1132_v0 = vmov 0   ;;  %v42_v33 = vlaneseq  ;;  %v1133_v38 = vmov 1.0   ;;  %s1134_s25 = smov 96   ;;  %s1135_s26 = smov 64   ;;  %s1742_s0 = inlined_call_operand.vmem [shape: s32[128,1], index: 0, kind: input, shape index: {}]   ;;  %s1743_s1 = inlined_call_operand.vmem [shape: f32[128,32], index: 1, kind: input, shape index: {}]   ;;  %s1744_s2 = inlined_call_operand.vmem [shape: f32[160,128], index: 2, kind: input, shape index: {}]   ;;  %s1745_s4 = inlined_call_operand.vmem [shape: s32[1,128], index: 4, kind: input, shape index: {}]   ;;  %s1746_s3 = inlined_call_operand.vmem [shape: f32[1,128], index: 3, kind: input, shape index: {}]   ;;  %s1747_s6 = inlined_call_operand.vmem [shape: f32[1,128], index: 6, kind: input, shape index: {}]   ;;  %s1748_s5 = inlined_call_operand.vmem [shape: f32[128,128], index: 5, kind: input, shape index: {}]   ;;  %s1749_s7 = inlined_call_operand.vmem [shape: f32[8,128], index: 7, kind: output, shape index: {}]  }
   0x1   :  { %1012 = vset.pattern.permute.xlu1 %v1132_v0  ;;  %1011 = vset.pattern.permute.xlu0 %v1132_v0  ;;  %v28_v1 = vld [vmem:[%s1742_s0 + $0x10] sm:$0xff]  ;;  %v26_v2 = vld [vmem:[%s1742_s0] sm:$0xff]  ;;  %v29_v4 = vld [vmem:[%s1742_s0 + $0x18] sm:$0xff]  ;;  %s1136_s27 = smov 32  }
   0x2   :  { %51 = vperm.xlu1 %1012, %v28_v1   ;;  %45 = vperm.xlu0 %1011, %v26_v2   ;;  %v30_v3 = vld [vmem:[%s1742_s0 + $0x20] sm:$0xff]  ;;  %v27_v5 = vld [vmem:[%s1742_s0 + $0x8] sm:$0xff]  ;;  %v155_v7 = vld [vmem:[%s1743_s1 + $0x78] sm:$0xff]  ;;  %v43_v34 = vand.u32 127, %v42_v33 }
   0x3   :  { %1013 = vset.pattern.permute.xlu2 %v1132_v0  ;;  %v31_v6 = vld [vmem:[%s1742_s0 + $0x28] sm:$0xff]  ;;  %156 = vmatpush.msra.mxu0 %v155_v7  ;;  %v154_v8 = vld [vmem:[%s1743_s1 + $0x70] sm:$0xff]  ;;  %v152_v10 = vld [vmem:[%s1743_s1 + $0x60] sm:$0xff] }
   0x4   :  { %57 = vperm.xlu2 %1013, %v30_v3   ;;  %973 = vmatpush.msra.mxu3 %v155_v7  ;;  %v153_v9 = vld [vmem:[%s1743_s1 + $0x68] sm:$0xff]  ;;  %v38_v11 = vld [vmem:[%s1742_s0 + $0x60] sm:$0xff]  ;;  %v32_v12 = vld [vmem:[%s1742_s0 + $0x30] sm:$0xff] }
   0x5   :  { %157 = vmatpush.msra.mxu0 %v154_v8  ;;  %v151_v13 = vld [vmem:[%s1743_s1 + $0x58] sm:$0xff]  ;;  %v150_v15 = vld [vmem:[%s1743_s1 + $0x50] sm:$0xff]  ;;  %v149_v16 = vld [vmem:[%s1743_s1 + $0x48] sm:$0xff] }
   0x6   :  { %974 = vmatpush.msra.mxu3 %v154_v8  ;;  %v33_v14 = vld [vmem:[%s1742_s0 + $0x38] sm:$0xff]  ;;  %v148_v17 = vld [vmem:[%s1743_s1 + $0x40] sm:$0xff]  ;;  %v39_v19 = vld [vmem:[%s1742_s0 + $0x68] sm:$0xff] }
   0x7   :  { %158 = vmatpush.msra.mxu0 %v153_v9  ;;  %v34_v18 = vld [vmem:[%s1742_s0 + $0x40] sm:$0xff]  ;;  %v147_v20 = vld [vmem:[%s1743_s1 + $0x38] sm:$0xff]  ;;  %v40_v21 = vld [vmem:[%s1742_s0 + $0x70] sm:$0xff] }
   0x8   :  { %975 = vmatpush.msra.mxu3 %v153_v9  ;;  %v146_v22 = vld [vmem:[%s1743_s1 + $0x30] sm:$0xff]  ;;  %v145_v23 = vld [vmem:[%s1743_s1 + $0x28] sm:$0xff]  ;;  %v144_v24 = vld [vmem:[%s1743_s1 + $0x20] sm:$0xff] }
   0x9   :  { %159 = vmatpush.msra.mxu0 %v152_v10  ;;  %v41_v25 = vld [vmem:[%s1742_s0 + $0x78] sm:$0xff]  ;;  %v35_v26 = vld [vmem:[%s1742_s0 + $0x48] sm:$0xff]  ;;  %v36_v28 = vld [vmem:[%s1742_s0 + $0x50] sm:$0xff] }
   0xa   :  { %54 = vperm.xlu1 %1012, %v29_v4   ;;  %48 = vperm.xlu0 %1011, %v27_v5   ;;  %v143_v27 = vld [vmem:[%s1743_s1 + $0x18] sm:$0xff]  ;;  %v142_v29 = vld [vmem:[%s1743_s1 + $0x10] sm:$0xff]  ;;  %v141_v30 = vld [vmem:[%s1743_s1 + $0x8] sm:$0xff] }
   0xb   :  { %976 = vmatpush.msra.mxu3 %v152_v10  ;;  %160 = vmatpush.msra.mxu0 %v151_v13  ;;  %v37_v31 = vld [vmem:[%s1742_s0 + $0x58] sm:$0xff]  ;;  %v140_v32 = vld [vmem:[%s1743_s1] sm:$0xff]  ;;  %v587_v53 = vld [vmem:[%s1744_s2 + $0x90] sm:$0xff] }
   0xc   :  { %60 = vperm.xlu2 %1013, %v31_v6   ;;  %v588_v52 = vld [vmem:[%s1744_s2 + $0x98] sm:$0xff]  ;;  %v586_v54 = vld [vmem:[%s1744_s2 + $0x88] sm:$0xff]  ;;  %v585_v55 = vld [vmem:[%s1744_s2 + $0x80] sm:$0xff] }
   0xd   :  { %977 = vmatpush.msra.mxu3 %v151_v13  ;;  %161 = vmatpush.msra.mxu0 %v150_v15 }
   0xe   :  { %698 = vmatpush.msra.mxu2 %v588_v52 }
   0xf   :  { %978 = vmatpush.msra.mxu3 %v150_v15  ;;  %162 = vmatpush.msra.mxu0 %v149_v16 }
  0x10   :  { %699 = vmatpush.msra.mxu2 %v587_v53 }
  0x11   :  { %979 = vmatpush.msra.mxu3 %v149_v16  ;;  %163 = vmatpush.msra.mxu0 %v148_v17 }
  0x12   :  { %81 = vperm.xlu1 %1012, %v38_v11   ;;  %63 = vperm.xlu0 %1011, %v32_v12  }
  0x13   :  { %980 = vmatpush.msra.mxu3 %v148_v17  ;;  %164 = vmatpush.msra.mxu0 %v147_v20 }
  0x14   :  { %66 = vperm.xlu2 %1013, %v33_v14   ;;  %700 = vmatpush.msra.mxu2 %v586_v54 }
  0x15   :  { %981 = vmatpush.msra.mxu3 %v147_v20  ;;  %165 = vmatpush.msra.mxu0 %v146_v22 }
  0x16   :  { %701 = vmatpush.msra.mxu2 %v585_v55 }
  0x17   :  { %982 = vmatpush.msra.mxu3 %v146_v22  ;;  %166 = vmatpush.msra.mxu0 %v145_v23 }
  0x19   :  { %983 = vmatpush.msra.mxu3 %v145_v23  ;;  %167 = vmatpush.msra.mxu0 %v144_v24 }
  0x1a   :  { %69 = vperm.xlu1 %1012, %v34_v18   ;;  %84 = vperm.xlu0 %1011, %v39_v19  }
  0x1b   :  { %984 = vmatpush.msra.mxu3 %v144_v24  ;;  %168 = vmatpush.msra.mxu0 %v143_v27 }
  0x1c   :  { %87 = vperm.xlu2 %1013, %v40_v21  }
  0x1d   :  { %985 = vmatpush.msra.mxu3 %v143_v27  ;;  %169 = vmatpush.msra.mxu0 %v142_v29 }
  0x1f   :  { %986 = vmatpush.msra.mxu3 %v142_v29  ;;  %170 = vmatpush.msra.mxu0 %v141_v30 }
  0x21   :  { %987 = vmatpush.msra.mxu3 %v141_v30  ;;  %171 = vmatpush.msra.mxu0 %v140_v32 }
  0x22   :  { %90 = vperm.xlu1 %1012, %v41_v25   ;;  %72 = vperm.xlu0 %1011, %v35_v26  }
  0x23   :  { %988 = vmatpush.msra.mxu3 %v140_v32 }
  0x24   :  { %75 = vperm.xlu2 %1013, %v36_v28  }
  0x2a   :  { %78 = vperm.xlu0 %1011, %v37_v31  }
  0x5e   :  { %v58_v35 = vpop.permute.xlu2 %57 }
  0x5f   :  { %vm96_vm6 = vcmp.eq.s32.totalorder %v58_v35, %v43_v34 }
  0x66   :  { %v61_v41 = vpop.permute.xlu2 %60 }
  0x67   :  { %vm97_vm8 = vcmp.eq.s32.totalorder %v61_v41, %v43_v34 }
  0x6e   :  { %v67_v44 = vpop.permute.xlu2 %66 }
  0x6f   :  { %vm99_vm11 = vcmp.eq.s32.totalorder %v67_v44, %v43_v34 }
  0x74   :  { %v52_v36 = vpop.permute.xlu1 %51  ;;  %v46_v37 = vpop.permute.xlu0 %45 }
  0x75   :  { %vm92_vm0 = vcmp.eq.s32.totalorder %v46_v37, %v43_v34  ;;  %vm94_vm2 = vcmp.eq.s32.totalorder %v52_v36, %v43_v34 }
  0x76   :  { %941 = vmatmul.msk.f32.vlgmr.msra.gmra.mxu0 %vm92_vm0, %v1133_v38  ;;  %v88_v47 = vpop.permute.xlu2 %87  ;;  %vm484_vm0 = vcmask 1043456  }
  0x77   :  { %vm106_vm7 = vcmp.eq.s32.totalorder %v88_v47, %v43_v34 }
  0x7c   :  { %v55_v39 = vpop.permute.xlu1 %54  ;;  %v49_v40 = vpop.permute.xlu0 %48 }
  0x7d   :  { %vm93_vm1 = vcmp.eq.s32.totalorder %v49_v40, %v43_v34  ;;  %vm95_vm4 = vcmp.eq.s32.totalorder %v55_v39, %v43_v34 }
  0x7e   :  { %942 = vmatmul.msk.f32.gmra.mxu0 %vm93_vm1, %v1133_v38  ;;  %v76_v50 = vpop.permute.xlu2 %75  ;;  %vm518_vm1 = vcmask 261120  }
  0x7f   :  { %vm102_vm14 = vcmp.eq.s32.totalorder %v76_v50, %v43_v34 }
  0x84   :  { %v82_v42 = vpop.permute.xlu1 %81  ;;  %v64_v43 = vpop.permute.xlu0 %63 }
  0x85   :  { %vm104_vm3 = vcmp.eq.s32.totalorder %v82_v42, %v43_v34  ;;  %vm98_vm10 = vcmp.eq.s32.totalorder %v64_v43, %v43_v34 }
  0x86   :  { %943 = vmatmul.msk.f32.gmra.mxu0 %vm94_vm2, %v1133_v38  ;;  %953 = vmatmul.msk.f32.vlgmr.msra.gmra.mxu3 %vm104_vm3, %v1133_v38  ;;  %vm402_vm2 = vcmask 1044480   ;;  %vm320_vm3 = vcmask 1045504  }
  0x8c   :  { %v85_v45 = vpop.permute.xlu0 %84  ;;  %v70_v46 = vpop.permute.xlu1 %69 }
  0x8d   :  { %vm105_vm5 = vcmp.eq.s32.totalorder %v85_v45, %v43_v34  ;;  %vm100_vm12 = vcmp.eq.s32.totalorder %v70_v46, %v43_v34 }
  0x8e   :  { %944 = vmatmul.msk.f32.gmra.mxu0 %vm95_vm4, %v1133_v38  ;;  %954 = vmatmul.msk.f32.gmra.mxu3 %vm105_vm5, %v1133_v38  ;;  %vm238_vm4 = vcmask 1046528   ;;  %vm535_vm5 = vcmask 523264  }
  0x94   :  { %v91_v48 = vpop.permute.xlu1 %90  ;;  %v73_v49 = vpop.permute.xlu0 %72 }
  0x95   :  { %vm107_vm9 = vcmp.eq.s32.totalorder %v91_v48, %v43_v34  ;;  %vm101_vm13 = vcmp.eq.s32.totalorder %v73_v49, %v43_v34 }
  0x96   :  { %945 = vmatmul.msk.f32.gmra.mxu0 %vm96_vm6, %v1133_v38  ;;  %955 = vmatmul.msk.f32.gmra.mxu3 %vm106_vm7, %v1133_v38  ;;  %vm552_vm6 = vcmask 785408  }
  0x9c   :  { %v79_v51 = vpop.permute.xlu0 %78 }
  0x9d   :  { %vm103_vm15 = vcmp.eq.s32.totalorder %v79_v51, %v43_v34 }
  0x9e   :  { %946 = vmatmul.msk.f32.gmra.mxu0 %vm97_vm8, %v1133_v38  ;;  %956 = vmatmul.msk.f32.gmra.mxu3 %vm107_vm9, %v1133_v38  ;;  %vm879_vm9 = vcmask 1041409  }
  0xa6   :  { %947 = vmatmul.msk.f32.gmra.mxu0 %vm98_vm10, %v1133_v38  ;;  %vm882_vm10 = vcmask 1042434  }
  0xae   :  { %948 = vmatmul.msk.f32.gmra.mxu0 %vm99_vm11, %v1133_v38  ;;  %vm885_vm11 = vcmask 1043459  }
  0xb6   :  { %949 = vmatmul.msk.f32.gmra.mxu0 %vm100_vm12, %v1133_v38  ;;  %vm888_vm12 = vcmask 1044484  }
  0xbe   :  { %950 = vmatmul.msk.f32.gmra.mxu0 %vm101_vm13, %v1133_v38  ;;  %vm891_vm13 = vcmask 1045509  }
  0xc6   :  { %951 = vmatmul.msk.f32.gmra.mxu0 %vm102_vm14, %v1133_v38  ;;  %vm894_vm14 = vcmask 1046534  }
  0xce   :  { %952 = vmatmul.msk.f32.gmra.mxu0 %vm103_vm15, %v1133_v38  ;;  %vm897_vm15 = vcmask 1047559  }
  0xf3   :  { %v1287_v56 = vpop.f32.mrf.mxu0 }
  0xf4   :  { %v485_v58 = vrot.slane %v1287_v56, 4  ;;  %v239_v0 = vrot.slane %v1287_v56, 1  ;;  %v321_v1 = vrot.slane %v1287_v56, 2  ;;  %v403_v2 = vrot.slane %v1287_v56, 3 }
  0xfb   :  { %v1289_v57 = vpop.f32.mrf.mxu0 }
  0xfc   :  { %v486_v59 = vrot.slane %v1289_v57, 4  ;;  %v240_v61 = vrot.slane %v1289_v57, 1  ;;  %v322_v62 = vrot.slane %v1289_v57, 2  ;;  %v404_v63 = vrot.slane %v1289_v57, 3 }
  0xfe   :  { %v487_v60 = vsel %vm484_vm0, %v485_v58, %v486_v59  ;;  %v405_v8 = vsel %vm402_vm2, %v403_v2, %v404_v63  ;;  %v323_v9 = vsel %vm320_vm3, %v321_v1, %v322_v62  ;;  %v241_v10 = vsel %vm238_vm4, %v239_v0, %v240_v61 }
  0xff   :  { %957 = vmatmul.msk.f32.vlgmr.msra.gmra.mxu2 %vm518_vm1, %v487_v60 }
 0x103   :  { %v1301_v3 = vpop.f32.mrf.mxu0 }
 0x104   :  { %v242_v4 = vrot.slane %v1301_v3, 1  ;;  %v324_v5 = vrot.slane %v1301_v3, 2  ;;  %v406_v6 = vrot.slane %v1301_v3, 3  ;;  %v488_v7 = vrot.slane %v1301_v3, 4 }
 0x106   :  { %v489_v11 = vsel %vm484_vm0, %v486_v59, %v488_v7  ;;  %v407_v12 = vsel %vm402_vm2, %v404_v63, %v406_v6  ;;  %v325_v13 = vsel %vm320_vm3, %v322_v62, %v324_v5  ;;  %v243_v14 = vsel %vm238_vm4, %v240_v61, %v242_v4 }
 0x107   :  { %958 = vmatmul.msk.f32.gmra.mxu2 %vm518_vm1, %v489_v11  ;;  %v1024_v15 = vpack.i.bf16 %v407_v12, %v405_v8  ;;  %v1019_v16 = vpack.i.bf16 %v325_v13, %v323_v9  ;;  %v1014_v17 = vpack.i.bf16 %v243_v14, %v241_v10 }
 0x109   :  { %1025 = vrot.lane.b32.xlu0 %v1024_v15, %s1134_s25  ;;  %1020 = vrot.lane.b32.xlu2 %v1019_v16, %s1135_s26  ;;  %v1365_v63 = vpop.f32.mrf.mxu3 }
 0x10a   :  { %1015 = vrot.lane.b32.xlu1 %v1014_v17, %s1136_s27 }
 0x10b   :  { %v1318_v18 = vpop.f32.mrf.mxu0 }
 0x10c   :  { %v490_v19 = vrot.slane %v1318_v18, 4  ;;  %v244_v21 = vrot.slane %v1318_v18, 1  ;;  %v326_v22 = vrot.slane %v1318_v18, 2  ;;  %v408_v23 = vrot.slane %v1318_v18, 3 }
 0x10e   :  { %v491_v20 = vsel %vm484_vm0, %v488_v7, %v490_v19  ;;  %v409_v29 = vsel %vm402_vm2, %v406_v6, %v408_v23  ;;  %v327_v30 = vsel %vm320_vm3, %v324_v5, %v326_v22  ;;  %v245_v31 = vsel %vm238_vm4, %v242_v4, %v244_v21 }
 0x10f   :  { %959 = vmatmul.msk.f32.gmra.mxu2 %vm518_vm1, %v491_v20 }
 0x111   :  { %v1378_v7 = vpop.f32.mrf.mxu3 }
 0x113   :  { %v1326_v24 = vpop.f32.mrf.mxu0 }
 0x114   :  { %v246_v25 = vrot.slane %v1326_v24, 1  ;;  %v328_v26 = vrot.slane %v1326_v24, 2  ;;  %v410_v27 = vrot.slane %v1326_v24, 3  ;;  %v492_v28 = vrot.slane %v1326_v24, 4 }
 0x116   :  { %v493_v32 = vsel %vm484_vm0, %v490_v19, %v492_v28  ;;  %v411_v34 = vsel %vm402_vm2, %v408_v23, %v410_v27  ;;  %v329_v35 = vsel %vm320_vm3, %v326_v22, %v328_v26  ;;  %v247_v36 = vsel %vm238_vm4, %v244_v21, %v246_v25 }
 0x117   :  { %960 = vmatmul.msk.f32.gmra.mxu2 %vm518_vm1, %v493_v32  ;;  %v1039_v37 = vpack.i.bf16 %v411_v34, %v409_v29  ;;  %v1034_v38 = vpack.i.bf16 %v329_v35, %v327_v30  ;;  %v1029_v39 = vpack.i.bf16 %v247_v36, %v245_v31  ;;  %v344_v29 = vrot.slane %v1365_v63, 2 }
 0x118   :  { %v426_v30 = vrot.slane %v1365_v63, 3 }
 0x119   :  { %1040 = vrot.lane.b32.xlu0 %v1039_v37, %s1134_s25  ;;  %1035 = vrot.lane.b32.xlu2 %v1034_v38, %s1135_s26  ;;  %v1405_v32 = vpop.f32.mrf.mxu3 }
 0x11a   :  { %1030 = vrot.lane.b32.xlu1 %v1029_v39, %s1136_s27 }
 0x11b   :  { %v1343_v40 = vpop.f32.mrf.mxu0 }
 0x11c   :  { %v494_v41 = vrot.slane %v1343_v40, 4  ;;  %v248_v43 = vrot.slane %v1343_v40, 1  ;;  %v330_v44 = vrot.slane %v1343_v40, 2  ;;  %v412_v45 = vrot.slane %v1343_v40, 3 }
 0x11e   :  { %v495_v42 = vsel %vm484_vm0, %v492_v28, %v494_v41  ;;  %v413_v51 = vsel %vm402_vm2, %v410_v27, %v412_v45  ;;  %v331_v52 = vsel %vm320_vm3, %v328_v26, %v330_v44  ;;  %v249_v53 = vsel %vm238_vm4, %v246_v25, %v248_v43 }
 0x11f   :  { %961 = vmatmul.msk.f32.gmra.mxu2 %vm518_vm1, %v495_v42  ;;  %v264_v25 = vrot.slane %v1378_v7, 1  ;;  %v346_v26 = vrot.slane %v1378_v7, 2  ;;  %v428_v27 = vrot.slane %v1378_v7, 3  ;;  %v262_v28 = vrot.slane %v1365_v63, 1 }
 0x121   :  { %v429_v38 = vsel %vm402_vm2, %v426_v30, %v428_v27  ;;  %v347_v39 = vsel %vm320_vm3, %v344_v29, %v346_v26 }
 0x123   :  { %v1351_v46 = vpop.f32.mrf.mxu0 }
 0x124   :  { %v250_v47 = vrot.slane %v1351_v46, 1  ;;  %v332_v48 = vrot.slane %v1351_v46, 2  ;;  %v414_v49 = vrot.slane %v1351_v46, 3  ;;  %v496_v50 = vrot.slane %v1351_v46, 4 }
 0x126   :  { %v497_v54 = vsel %vm484_vm0, %v494_v41, %v496_v50  ;;  %v415_v55 = vsel %vm402_vm2, %v412_v45, %v414_v49  ;;  %v333_v58 = vsel %vm320_vm3, %v330_v44, %v332_v48  ;;  %v251_v59 = vsel %vm238_vm4, %v248_v43, %v250_v47 }
 0x127   :  { %962 = vmatmul.msk.f32.gmra.mxu2 %vm518_vm1, %v497_v54  ;;  %v1054_v60 = vpack.i.bf16 %v415_v55, %v413_v51  ;;  %v1049_v61 = vpack.i.bf16 %v333_v58, %v331_v52  ;;  %v1044_v62 = vpack.i.bf16 %v251_v59, %v249_v53  ;;  %v265_v41 = vsel %vm238_vm4, %v262_v28, %v264_v25  ;;  %v584_v53 = vld [vmem:[%s1744_s2 + $0x78] sm:$0xff] }
 0x128   :  { %v348_v51 = vrot.slane %v1405_v32, 2  ;;  %v430_v52 = vrot.slane %v1405_v32, 3  ;;  %621 = vmatpush.msra.mxu1 %v584_v53  ;;  %989 = vmatpush.msrb.mxu3 %v584_v53 }
 0x129   :  { %1055 = vrot.lane.b32.xlu0 %v1054_v60, %s1134_s25  ;;  %1050 = vrot.lane.b32.xlu2 %v1049_v61, %s1135_s26  ;;  %v583_v61 = vld [vmem:[%s1744_s2 + $0x70] sm:$0xff] }
 0x12a   :  { %1045 = vrot.lane.b32.xlu1 %v1044_v62, %s1136_s27  ;;  %v582_v62 = vld [vmem:[%s1744_s2 + $0x68] sm:$0xff]  ;;  %622 = vmatpush.msra.mxu1 %v583_v61 }
 0x12b   :  { %v1370_v0 = vpop.f32.mrf.mxu0  ;;  %990 = vmatpush.msrb.mxu3 %v583_v61 }
 0x12c   :  { %v498_v1 = vrot.slane %v1370_v0, 4  ;;  %v252_v4 = vrot.slane %v1370_v0, 1  ;;  %v334_v5 = vrot.slane %v1370_v0, 2  ;;  %v416_v6 = vrot.slane %v1370_v0, 3  ;;  %623 = vmatpush.msra.mxu1 %v582_v62 }
 0x12d   :  { %991 = vmatpush.msrb.mxu3 %v582_v62 }
 0x12e   :  { %v499_v2 = vsel %vm484_vm0, %v496_v50, %v498_v1  ;;  %v417_v13 = vsel %vm402_vm2, %v414_v49, %v416_v6  ;;  %v335_v14 = vsel %vm320_vm3, %v332_v48, %v334_v5  ;;  %v253_v15 = vsel %vm238_vm4, %v250_v47, %v252_v4 }
 0x12f   :  { %963 = vmatmul.msk.f32.gmra.mxu2 %vm518_vm1, %v499_v2  ;;  %v266_v50 = vrot.slane %v1405_v32, 1  ;;  %v349_v2 = vsel %vm320_vm3, %v346_v26, %v348_v51 }
 0x133   :  { %v1380_v8 = vpop.f32.mrf.mxu0 }
 0x134   :  { %v254_v9 = vrot.slane %v1380_v8, 1  ;;  %v336_v10 = vrot.slane %v1380_v8, 2  ;;  %v418_v11 = vrot.slane %v1380_v8, 3  ;;  %v500_v12 = vrot.slane %v1380_v8, 4 }
 0x136   :  { %v501_v16 = vsel %vm484_vm0, %v498_v1, %v500_v12  ;;  %v419_v17 = vsel %vm402_vm2, %v416_v6, %v418_v11  ;;  %v337_v19 = vsel %vm320_vm3, %v334_v5, %v336_v10  ;;  %v255_v20 = vsel %vm238_vm4, %v252_v4, %v254_v9  ;;  %v1449_v5 = vpop.f32.mrf.mxu3 }
 0x137   :  { %964 = vmatmul.msk.f32.gmra.mxu2 %vm518_vm1, %v501_v16  ;;  %v1069_v21 = vpack.i.bf16 %v419_v17, %v417_v13  ;;  %v1064_v22 = vpack.i.bf16 %v337_v19, %v335_v14  ;;  %v1059_v23 = vpack.i.bf16 %v255_v20, %v253_v15  ;;  %v431_v1 = vsel %vm402_vm2, %v428_v27, %v430_v52  ;;  %v581_v15 = vld [vmem:[%s1744_s2 + $0x60] sm:$0xff]  ;;  %v580_v20 = vld [vmem:[%s1744_s2 + $0x58] sm:$0xff] }
 0x138   :  { %v267_v4 = vsel %vm238_vm4, %v264_v25, %v266_v50  ;;  %v268_v16 = vrot.slane %v1449_v5, 1  ;;  %v350_v17 = vrot.slane %v1449_v5, 2  ;;  %v432_v19 = vrot.slane %v1449_v5, 3  ;;  %624 = vmatpush.msra.mxu1 %v581_v15  ;;  %992 = vmatpush.msrb.mxu3 %v581_v15 }
 0x139   :  { %1070 = vrot.lane.b32.xlu0 %v1069_v21, %s1134_s25  ;;  %1065 = vrot.lane.b32.xlu2 %v1064_v22, %s1135_s26  ;;  %v579_v22 = vld [vmem:[%s1744_s2 + $0x50] sm:$0xff]  ;;  %v512_v15 = vrot.slane %v1405_v32, 4 }
 0x13a   :  { %1060 = vrot.lane.b32.xlu1 %v1059_v23, %s1136_s27  ;;  %625 = vmatpush.msra.mxu1 %v580_v20 }
 0x13b   :  { %v1403_v31 = vpop.f32.mrf.mxu0  ;;  %993 = vmatpush.msrb.mxu3 %v580_v20 }
 0x13c   :  { %v256_v34 = vrot.slane %v1403_v31, 1  ;;  %v338_v35 = vrot.slane %v1403_v31, 2  ;;  %v420_v36 = vrot.slane %v1403_v31, 3  ;;  %v502_v37 = vrot.slane %v1403_v31, 4  ;;  %626 = vmatpush.msra.mxu1 %v579_v22 }
 0x13d   :  { %994 = vmatpush.msrb.mxu3 %v579_v22 }
 0x13e   :  { %v503_v42 = vsel %vm484_vm0, %v500_v12, %v502_v37  ;;  %v421_v43 = vsel %vm402_vm2, %v418_v11, %v420_v36  ;;  %v339_v44 = vsel %vm320_vm3, %v336_v10, %v338_v35  ;;  %v257_v45 = vsel %vm238_vm4, %v254_v9, %v256_v34 }
 0x13f   :  { %965 = vmatmul.msk.f32.gmra.mxu2 %vm518_vm1, %v503_v42  ;;  %v1084_v47 = vpack.i.bf16 %v421_v43, %v429_v38  ;;  %v1079_v48 = vpack.i.bf16 %v339_v44, %v347_v39  ;;  %v1074_v49 = vpack.i.bf16 %v257_v45, %v265_v41 }
 0x141   :  { %1085 = vrot.lane.b32.xlu0 %v1084_v47, %s1134_s25  ;;  %1080 = vrot.lane.b32.xlu2 %v1079_v48, %s1135_s26  ;;  %v577_v47 = vld [vmem:[%s1744_s2 + $0x40] sm:$0xff]  ;;  %v576_v48 = vld [vmem:[%s1744_s2 + $0x38] sm:$0xff] }
 0x142   :  { %1075 = vrot.lane.b32.xlu1 %v1074_v49, %s1136_s27  ;;  %v1137_v49 = vmov 0.0  }
 0x143   :  { %v1434_v54 = vpop.f32.mrf.mxu0  ;;  %v434_v53 = vrot.slane %v1137_v49, 3 }
 0x144   :  { %v258_v55 = vrot.slane %v1434_v54, 1  ;;  %v340_v58 = vrot.slane %v1434_v54, 2  ;;  %v422_v59 = vrot.slane %v1434_v54, 3  ;;  %v504_v60 = vrot.slane %v1434_v54, 4 }
 0x146   :  { %v505_v6 = vsel %vm484_vm0, %v502_v37, %v504_v60  ;;  %v423_v9 = vsel %vm402_vm2, %v420_v36, %v422_v59  ;;  %v341_v10 = vsel %vm320_vm3, %v338_v35, %v340_v58  ;;  %v259_v11 = vsel %vm238_vm4, %v256_v34, %v258_v55  ;;  %v578_v37 = vld [vmem:[%s1744_s2 + $0x48] sm:$0xff] }
 0x147   :  { %966 = vmatmul.msk.f32.gmra.mxu2 %vm518_vm1, %v505_v6  ;;  %v1099_v12 = vpack.i.bf16 %v423_v9, %v431_v1  ;;  %v1094_v13 = vpack.i.bf16 %v341_v10, %v349_v2  ;;  %v1089_v14 = vpack.i.bf16 %v259_v11, %v267_v4  ;;  %v433_v34 = vsel %vm402_vm2, %v430_v52, %v432_v19  ;;  %v573_v2 = vld [vmem:[%s1744_s2 + $0x20] sm:$0xff]  ;;  %v572_v6 = vld [vmem:[%s1744_s2 + $0x18] sm:$0xff]  ;;  %v571_v10 = vld [vmem:[%s1744_s2 + $0x10] sm:$0xff] }
 0x148   :  { %v351_v35 = vsel %vm320_vm3, %v348_v51, %v350_v17  ;;  %v269_v36 = vsel %vm238_vm4, %v266_v50, %v268_v16  ;;  %627 = vmatpush.msra.mxu1 %v578_v37  ;;  %v352_v50 = vrot.slane %v1137_v49, 2  ;;  %v270_v51 = vrot.slane %v1137_v49, 1  ;;  %995 = vmatpush.msrb.mxu3 %v578_v37  ;;  %v570_v11 = vld [vmem:[%s1744_s2 + $0x8] sm:$0xff] }
 0x149   :  { %1100 = vrot.lane.b32.xlu0 %v1099_v12, %s1134_s25  ;;  %1095 = vrot.lane.b32.xlu2 %v1094_v13, %s1135_s26  ;;  %v508_v52 = vrot.slane %v1365_v63, 4  ;;  %v510_v9 = vrot.slane %v1378_v7, 4  ;;  %v569_v13 = vld [vmem:[%s1744_s2] sm:$0xff] }
 0x14a   :  { %1090 = vrot.lane.b32.xlu1 %v1089_v14, %s1136_s27  ;;  %628 = vmatpush.msra.mxu1 %v577_v47  ;;  %v353_v62 = vsel %vm320_vm3, %v350_v17, %v352_v50  ;;  %v271_v1 = vsel %vm238_vm4, %v268_v16, %v270_v51  ;;  %v514_v17 = vrot.slane %v1449_v5, 4 }
 0x14b   :  { %v1468_v21 = vpop.f32.mrf.mxu0  ;;  %996 = vmatpush.msrb.mxu3 %v577_v47  ;;  %v511_v12 = vsel %vm484_vm0, %v508_v52, %v510_v9  ;;  %v513_v16 = vsel %vm484_vm0, %v510_v9, %v512_v15 }
 0x14c   :  { %v260_v23 = vrot.slane %v1468_v21, 1  ;;  %v342_v25 = vrot.slane %v1468_v21, 2  ;;  %v424_v26 = vrot.slane %v1468_v21, 3  ;;  %v506_v27 = vrot.slane %v1468_v21, 4  ;;  %629 = vmatpush.msra.mxu1 %v576_v48 }
 0x14d   :  { %997 = vmatpush.msrb.mxu3 %v576_v48 }
 0x14e   :  { %v507_v38 = vsel %vm484_vm0, %v504_v60, %v506_v27  ;;  %v425_v39 = vsel %vm402_vm2, %v422_v59, %v424_v26  ;;  %v343_v41 = vsel %vm320_vm3, %v340_v58, %v342_v25  ;;  %v261_v42 = vsel %vm238_vm4, %v258_v55, %v260_v23  ;;  %v575_v58 = vld [vmem:[%s1744_s2 + $0x30] sm:$0xff]  ;;  %v574_v60 = vld [vmem:[%s1744_s2 + $0x28] sm:$0xff] }
 0x14f   :  { %967 = vmatmul.msk.f32.gmra.mxu2 %vm518_vm1, %v507_v38  ;;  %v1114_v43 = vpack.i.bf16 %v425_v39, %v433_v34  ;;  %v1109_v44 = vpack.i.bf16 %v343_v41, %v351_v35  ;;  %v1104_v45 = vpack.i.bf16 %v261_v42, %v269_v36  ;;  %v345_v55 = vsel %vm320_vm3, %v342_v25, %v344_v29 }
 0x150   :  { %v263_v59 = vsel %vm238_vm4, %v260_v23, %v262_v28  ;;  %v509_v61 = vsel %vm484_vm0, %v506_v27, %v508_v52  ;;  %630 = vmatpush.msra.mxu1 %v575_v58  ;;  %v1124_v29 = vpack.i.bf16 %v345_v55, %v353_v62  ;;  %v435_v28 = vsel %vm402_vm2, %v432_v19, %v434_v53 }
 0x151   :  { %1115 = vrot.lane.b32.xlu0 %v1114_v43, %s1134_s25  ;;  %1110 = vrot.lane.b32.xlu2 %v1109_v44, %s1135_s26  ;;  %v1119_v4 = vpack.i.bf16 %v263_v59, %v271_v1  ;;  %v427_v14 = vsel %vm402_vm2, %v424_v26, %v426_v30  ;;  %v515_v19 = vsel %vm484_vm0, %v512_v15, %v514_v17  ;;  %v516_v30 = vrot.slane %v1137_v49, 4 }
 0x152   :  { %1105 = vrot.lane.b32.xlu1 %v1104_v45, %s1136_s27  ;;  %631 = vmatpush.msra.mxu1 %v574_v60 }
 0x153   :  { %998 = vmatpush.msrb.mxu3 %v575_v58  ;;  %v517_v20 = vsel %vm484_vm0, %v514_v17, %v516_v30 }
 0x154   :  { %632 = vmatpush.msra.mxu1 %v573_v2 }
 0x155   :  { %999 = vmatpush.msrb.mxu3 %v574_v60 }
 0x156   :  { %633 = vmatpush.msra.mxu1 %v572_v6 }
 0x157   :  { %968 = vmatmul.msk.f32.gmra.mxu2 %vm518_vm1, %v509_v61  ;;  %1000 = vmatpush.msrb.mxu3 %v573_v2 }
 0x158   :  { %634 = vmatpush.msra.mxu1 %v571_v10 }
 0x159   :  { %466 = vrot.lane.b32.xlu0 %v435_v28, %s1134_s25  ;;  %1125 = vrot.lane.b32.xlu2 %v1124_v29, %s1135_s26 }
 0x15a   :  { %1120 = vrot.lane.b32.xlu1 %v1119_v4, %s1136_s27  ;;  %635 = vmatpush.msra.mxu1 %v570_v11 }
 0x15b   :  { %1001 = vmatpush.msrb.mxu3 %v572_v6 }
 0x15c   :  { %636 = vmatpush.msra.mxu1 %v569_v13 }
 0x15d   :  { %1002 = vmatpush.msrb.mxu3 %v571_v10 }
 0x15f   :  { %969 = vmatmul.msk.f32.gmra.mxu2 %vm518_vm1, %v511_v12  ;;  %1003 = vmatpush.msrb.mxu3 %v570_v11 }
 0x161   :  { %1004 = vmatpush.msrb.mxu3 %v569_v13 }
 0x162   :  { %458 = vrot.lane.b32.xlu1 %v427_v14, %s1134_s25 }
 0x163   :  { %v1021_v22 = vpop.permute.xlu2 %1020 }
 0x164   :  { %v1022_v27 = vunpack.i.l.bf16 %v1021_v22  ;;  %v1023_v41 = vunpack.i.h.bf16 %v1021_v22 }
 0x167   :  { %970 = vmatmul.msk.f32.gmra.mxu2 %vm518_vm1, %v513_v16 }
 0x16f   :  { %971 = vmatmul.msk.f32.gmra.mxu2 %vm518_vm1, %v515_v19 }
 0x173   :  { %v1036_v45 = vpop.permute.xlu2 %1035 }
 0x174   :  { %v1038_v58 = vunpack.i.h.bf16 %v1036_v45 }
 0x177   :  { %972 = vmatmul.msk.f32.gmra.mxu2 %vm518_vm1, %v517_v20 }
 0x17b   :  { %v1026_v25 = vpop.permute.xlu0 %1025 }
 0x17c   :  { %v1016_v23 = vpop.permute.xlu1 %1015  ;;  %v1027_v35 = vunpack.i.l.bf16 %v1026_v25  ;;  %v1028_v43 = vunpack.i.h.bf16 %v1026_v25 }
 0x17d   :  { %v1017_v26 = vunpack.i.l.bf16 %v1016_v23  ;;  %v1018_v34 = vunpack.i.h.bf16 %v1016_v23 }
 0x17f   :  { %v519_v36 = vsel %vm518_vm1, %v1287_v56, %v1017_v26  ;;  %v520_v39 = vsel %vm518_vm1, %v1289_v57, %v1018_v34  ;;  %v1037_v56 = vunpack.i.l.bf16 %v1036_v45 }
 0x180   :  { %v536_v37 = vsel %vm535_vm5, %v519_v36, %v1022_v27  ;;  %v537_v42 = vsel %vm535_vm5, %v520_v39, %v1023_v41 }
 0x181   :  { %v553_v38 = vsel %vm552_vm6, %v536_v37, %v1027_v35  ;;  %v554_v44 = vsel %vm552_vm6, %v537_v42, %v1028_v43 }
 0x182   :  { %637 = vmatmul.f32.vlgmr.msra.gmra.mxu1 %v553_v38 }
 0x183   :  { %v1051_v62 = vpop.permute.xlu2 %1050 }
 0x184   :  { %v1053_v12 = vunpack.i.h.bf16 %v1051_v62 }
 0x18a   :  { %640 = vmatmul.f32.gmra.mxu1 %v554_v44 }
 0x18b   :  { %v1041_v48 = vpop.permute.xlu0 %1040 }
 0x18c   :  { %v1031_v47 = vpop.permute.xlu1 %1030  ;;  %v1042_v51 = vunpack.i.l.bf16 %v1041_v48  ;;  %v1043_v60 = vunpack.i.h.bf16 %v1041_v48 }
 0x18d   :  { %v1032_v49 = vunpack.i.l.bf16 %v1031_v47  ;;  %v1033_v50 = vunpack.i.h.bf16 %v1031_v47 }
 0x18f   :  { %v521_v52 = vsel %vm518_vm1, %v1301_v3, %v1032_v49  ;;  %v522_v55 = vsel %vm518_vm1, %v1318_v18, %v1033_v50  ;;  %v1052_v3 = vunpack.i.l.bf16 %v1051_v62 }
 0x190   :  { %v538_v53 = vsel %vm535_vm5, %v521_v52, %v1037_v56  ;;  %v539_v59 = vsel %vm535_vm5, %v522_v55, %v1038_v58 }
 0x191   :  { %v555_v57 = vsel %vm552_vm6, %v538_v53, %v1042_v51  ;;  %v556_v61 = vsel %vm552_vm6, %v539_v59, %v1043_v60  ;;  %v703_v53 = vpop.f32.mrf.mxu2 }
 0x192   :  { %643 = vmatmul.f32.gmra.mxu1 %v555_v57 }
 0x193   :  { %v1066_v10 = vpop.permute.xlu2 %1065 }
 0x194   :  { %v1067_v30 = vunpack.i.l.bf16 %v1066_v10  ;;  %v1068_v34 = vunpack.i.h.bf16 %v1066_v10 }
 0x19a   :  { %646 = vmatmul.f32.gmra.mxu1 %v556_v61 }
 0x19b   :  { %v1056_v1 = vpop.permute.xlu0 %1055  ;;  %v1081_v19 = vpop.permute.xlu2 %1080 }
 0x19c   :  { %v1046_v29 = vpop.permute.xlu1 %1045  ;;  %v1057_v4 = vunpack.i.l.bf16 %v1056_v1  ;;  %v1058_v14 = vunpack.i.h.bf16 %v1056_v1  ;;  %v1082_v37 = vunpack.i.l.bf16 %v1081_v19  ;;  %v1083_v49 = vunpack.i.h.bf16 %v1081_v19 }
 0x19d   :  { %v1047_v2 = vunpack.i.l.bf16 %v1046_v29  ;;  %v1048_v28 = vunpack.i.h.bf16 %v1046_v29 }
 0x19f   :  { %v523_v6 = vsel %vm518_vm1, %v1326_v24, %v1047_v2  ;;  %v524_v11 = vsel %vm518_vm1, %v1343_v40, %v1048_v28 }
 0x1a0   :  { %v540_v9 = vsel %vm535_vm5, %v523_v6, %v1052_v3  ;;  %v541_v13 = vsel %vm535_vm5, %v524_v11, %v1053_v12  ;;  %v706_v11 = vpop.f32.mrf.mxu2 }
 0x1a1   :  { %v557_v18 = vsel %vm552_vm6, %v540_v9, %v1057_v4  ;;  %v558_v15 = vsel %vm552_vm6, %v541_v13, %v1058_v14 }
 0x1a2   :  { %649 = vmatmul.f32.gmra.mxu1 %v557_v18 }
 0x1a3   :  { %v1096_v39 = vpop.permute.xlu2 %1095 }
 0x1a4   :  { %v1097_v51 = vunpack.i.l.bf16 %v1096_v39  ;;  %v1098_v29 = vunpack.i.h.bf16 %v1096_v39 }
 0x1aa   :  { %652 = vmatmul.f32.gmra.mxu1 %v558_v15 }
 0x1ab   :  { %v1071_v16 = vpop.permute.xlu0 %1070  ;;  %v1111_v60 = vpop.permute.xlu2 %1110 }
 0x1ac   :  { %v1061_v17 = vpop.permute.xlu1 %1060  ;;  %v1072_v22 = vunpack.i.l.bf16 %v1071_v16  ;;  %v1073_v41 = vunpack.i.h.bf16 %v1071_v16  ;;  %v1112_v28 = vunpack.i.l.bf16 %v1111_v60  ;;  %v1113_v15 = vunpack.i.h.bf16 %v1111_v60 }
 0x1ad   :  { %v1062_v24 = vunpack.i.l.bf16 %v1061_v17  ;;  %v1063_v20 = vunpack.i.h.bf16 %v1061_v17 }
 0x1af   :  { %v525_v23 = vsel %vm518_vm1, %v1351_v46, %v1062_v24  ;;  %v526_v27 = vsel %vm518_vm1, %v1370_v0, %v1063_v20 }
 0x1b0   :  { %v542_v25 = vsel %vm535_vm5, %v525_v23, %v1067_v30  ;;  %v543_v38 = vsel %vm535_vm5, %v526_v27, %v1068_v34 }
 0x1b1   :  { %v559_v40 = vsel %vm552_vm6, %v542_v25, %v1072_v22  ;;  %v560_v45 = vsel %vm552_vm6, %v543_v38, %v1073_v41 }
 0x1b2   :  { %655 = vmatmul.f32.gmra.mxu1 %v559_v40 }
 0x1b3   :  { %v1086_v26 = vpop.permute.xlu0 %1085  ;;  %v1126_v13 = vpop.permute.xlu2 %1125 }
 0x1b4   :  { %v1076_v35 = vpop.permute.xlu1 %1075  ;;  %v1087_v43 = vunpack.i.l.bf16 %v1086_v26  ;;  %v1127_v19 = vunpack.i.l.bf16 %v1126_v13  ;;  %v1128_v27 = vunpack.i.h.bf16 %v1126_v13 }
 0x1b5   :  { %v1077_v36 = vunpack.i.l.bf16 %v1076_v35  ;;  %v1078_v42 = vunpack.i.h.bf16 %v1076_v35 }
 0x1b7   :  { %v531_v46 = vsel %vm518_vm1, %v1365_v63, %v1077_v36  ;;  %v527_v48 = vsel %vm518_vm1, %v1380_v8, %v1078_v42  ;;  %v1088_v63 = vunpack.i.h.bf16 %v1086_v26  ;;  %v752_v42 = vshrl.u32 %v42_v33, 7 }
 0x1b8   :  { %v548_v44 = vsel %vm535_vm5, %v531_v46, %v1082_v37  ;;  %v544_v52 = vsel %vm535_vm5, %v527_v48, %v1083_v49 }
 0x1b9   :  { %v565_v47 = vsel %vm552_vm6, %v548_v44, %v1087_v43  ;;  %v561_v61 = vsel %vm552_vm6, %v544_v52, %v1088_v63  ;;  %v1129_v43 = vld [vmem:[%s1745_s4] ss:$0 sm:$0xff]  ;;  %v753_v46 = vadd.s32 8, %v752_v42 }
 0x1ba   :  { %658 = vmatmul.f32.gmra.mxu1 %v560_v45  ;;  %673 = vmatmul.f32.vlgmr.msrb.gmra.mxu3 %v565_v47  ;;  %vm1620_vm7 = vcmp.le.s32.totalorder %v752_v42, %v1129_v43 }
 0x1bb   :  { %v1101_v0 = vpop.permute.xlu0 %1100  ;;  %vm1624_vm8 = vcmp.le.s32.totalorder %v753_v46, %v1129_v43  ;;  %v862_v43 = vld [vmem:[%s1748_s5 + $0x60] sm:$0xff] }
 0x1bc   :  { %v1091_v56 = vpop.permute.xlu1 %1090  ;;  %v1102_v55 = vunpack.i.l.bf16 %v1101_v0 }
 0x1bd   :  { %v1092_v50 = vunpack.i.l.bf16 %v1091_v56  ;;  %v1093_v57 = vunpack.i.h.bf16 %v1091_v56 }
 0x1bf   :  { %v532_v58 = vsel %vm518_vm1, %v1378_v7, %v1092_v50  ;;  %v528_v62 = vsel %vm518_vm1, %v1403_v31, %v1093_v57  ;;  %v1103_v7 = vunpack.i.h.bf16 %v1101_v0 }
 0x1c0   :  { %v549_v59 = vsel %vm535_vm5, %v532_v58, %v1097_v51  ;;  %v545_v4 = vsel %vm535_vm5, %v528_v62, %v1098_v29 }
 0x1c1   :  { %v566_v8 = vsel %vm552_vm6, %v549_v59, %v1102_v55  ;;  %v562_v12 = vsel %vm552_vm6, %v545_v4, %v1103_v7 }
 0x1c2   :  { %661 = vmatmul.f32.gmra.mxu1 %v561_v61  ;;  %676 = vmatmul.f32.gmra.mxu3 %v566_v8 }
 0x1c3   :  { %v1116_v2 = vpop.permute.xlu0 %1115 }
 0x1c4   :  { %v1106_v1 = vpop.permute.xlu1 %1105  ;;  %v1117_v9 = vunpack.i.l.bf16 %v1116_v2 }
 0x1c5   :  { %v1107_v3 = vunpack.i.l.bf16 %v1106_v1  ;;  %v1108_v6 = vunpack.i.h.bf16 %v1106_v1 }
 0x1c7   :  { %v533_v18 = vsel %vm518_vm1, %v1405_v32, %v1107_v3  ;;  %v529_v14 = vsel %vm518_vm1, %v1434_v54, %v1108_v6  ;;  %v1118_v32 = vunpack.i.h.bf16 %v1116_v2  ;;  %v709_v54 = vpop.f32.mrf.mxu2 }
 0x1c8   :  { %v550_v10 = vsel %vm535_vm5, %v533_v18, %v1112_v28  ;;  %v546_v24 = vsel %vm535_vm5, %v529_v14, %v1113_v15 }
 0x1c9   :  { %v567_v31 = vsel %vm552_vm6, %v550_v10, %v1117_v9  ;;  %v563_v25 = vsel %vm552_vm6, %v546_v24, %v1118_v32  ;;  %v1645_v9 = vld [vmem:[%s1746_s3] ss:$0 sm:$0xff] }
 0x1ca   :  { %664 = vmatmul.f32.gmra.mxu1 %v562_v12  ;;  %679 = vmatmul.f32.gmra.mxu3 %v567_v31 }
 0x1cb   :  { %v467_v20 = vpop.permute.xlu0 %466 }
 0x1cc   :  { %v1121_v16 = vpop.permute.xlu1 %1120 }
 0x1cd   :  { %v1122_v17 = vunpack.i.l.bf16 %v1121_v16  ;;  %v1123_v23 = vunpack.i.h.bf16 %v1121_v16 }
 0x1cf   :  { %v534_v30 = vsel %vm518_vm1, %v1449_v5, %v1122_v17  ;;  %v530_v26 = vsel %vm518_vm1, %v1468_v21, %v1123_v23  ;;  %v712_v36 = vpop.f32.mrf.mxu2 }
 0x1d0   :  { %v551_v22 = vsel %vm535_vm5, %v534_v30, %v1127_v19  ;;  %v547_v35 = vsel %vm535_vm5, %v530_v26, %v1128_v27 }
 0x1d1   :  { %v568_v40 = vsel %vm552_vm6, %v551_v22, %v467_v20 }
 0x1d2   :  { %667 = vmatmul.f32.gmra.mxu1 %v563_v25  ;;  %682 = vmatmul.f32.gmra.mxu3 %v568_v40 }
 0x1d4   :  { %v459_v34 = vpop.permute.xlu1 %458 }
 0x1d5   :  { %v564_v5 = vsel %vm552_vm6, %v547_v35, %v459_v34 }
 0x1d7   :  { %v715_v37 = vpop.f32.mrf.mxu2 }
 0x1da   :  { %670 = vmatmul.f32.gmra.mxu1 %v564_v5  ;;  %v864_v5 = vld [vmem:[%s1748_s5 + $0x70] sm:$0xff] }
 0x1df   :  { %v718_v38 = vpop.f32.mrf.mxu2 }
 0x1e7   :  { %v721_v39 = vpop.f32.mrf.mxu2 }
 0x1ef   :  { %v724_v21 = vpop.f32.mrf.mxu2 }
 0x1f7   :  { %v1632_v50 = vpop.f32.mrf.mxu2 }
 0x1ff   :  { %v638_v41 = vpop.f32.mrf.mxu1  ;;  %v1634_v58 = vpop.f32.mrf.mxu2 }
 0x200   :  { %v704_v44 = vadd.f32 %v703_v53, %v638_v41 }
 0x202   :  { %v758_v33 = vsel %vm1620_vm7, %v704_v44, -1e+30  ;;  %v861_v44 = vld [vmem:[%s1748_s5 + $0x58] sm:$0xff] }
 0x207   :  { %v641_v47 = vpop.f32.mrf.mxu1  ;;  %v1640_v4 = vpop.f32.mrf.mxu2 }
 0x208   :  { %v707_v48 = vadd.f32 %v706_v11, %v641_v47 }
 0x20a   :  { %v759_v49 = vsel %vm1624_vm8, %v707_v48, -1e+30 }
 0x20b   :  { %v774_v56 = vmax.f32 %v758_v33, %v759_v49  ;;  %v860_v49 = vld [vmem:[%s1748_s5 + $0x50] sm:$0xff] }
 0x20d   :  { %v775_v52 = vrot.slane %v774_v56, 4 }
 0x20f   :  { %v644_v51 = vpop.f32.mrf.mxu1  ;;  %v776_v53 = vmax.f32 %v774_v56, %v775_v52  ;;  %v1653_v24 = vpop.f32.mrf.mxu2  ;;  %v859_v52 = vld [vmem:[%s1748_s5 + $0x48] sm:$0xff] }
 0x210   :  { %v710_v63 = vadd.f32 %v709_v54, %v644_v51  ;;  %v865_v54 = vld [vmem:[%s1748_s5 + $0x78] sm:$0xff] }
 0x211   :  { %v777_v59 = vrot.slane %v776_v53, 2  ;;  %900 = vmatpush.msra.mxu3 %v865_v54  ;;  %v851_v54 = vld [vmem:[%s1748_s5 + $0x8] sm:$0xff] }
 0x212   :  { %v760_v60 = vsel %vm1620_vm7, %v710_v63, -1e+30 }
 0x213   :  { %v778_v62 = vmax.f32 %v776_v53, %v777_v59  ;;  %901 = vmatpush.msra.mxu3 %v864_v5 }
 0x215   :  { %v779_v3 = vrot.slane %v778_v62, 1 }
 0x217   :  { %v647_v57 = vpop.f32.mrf.mxu1  ;;  %v780_v6 = vmax.f32 %v778_v62, %v779_v3  ;;  %v739_v34 = vpop.f32.mrf.mxu2  ;;  %v856_v3 = vld [vmem:[%s1748_s5 + $0x30] sm:$0xff] }
 0x218   :  { %v713_v55 = vadd.f32 %v712_v36, %v647_v57  ;;  %v858_v57 = vld [vmem:[%s1748_s5 + $0x40] sm:$0xff] }
 0x219   :  { %v834_v13 = vadd.f32 %v1645_v9, %v780_v6 }
 0x21a   :  { %v761_v61 = vsel %vm1624_vm8, %v713_v55, -1e+30 }
 0x21b   :  { %v781_v8 = vmax.f32 %v760_v60, %v761_v61  ;;  %v842_v32 = vmax.f32 %v834_v13, 0.0  ;;  %v857_v61 = vld [vmem:[%s1748_s5 + $0x38] sm:$0xff] }
 0x21d   :  { %v782_v29 = vrot.slane %v781_v8, 4 }
 0x21f   :  { %v783_v1 = vmax.f32 %v781_v8, %v782_v29  ;;  %v650_v2 = vpop.f32.mrf.mxu1  ;;  %v742_v56 = vpop.f32.mrf.mxu2 }
 0x220   :  { %v716_v10 = vadd.f32 %v715_v37, %v650_v2  ;;  %v863_v37 = vld [vmem:[%s1748_s5 + $0x68] sm:$0xff] }
 0x221   :  { %v784_v28 = vrot.slane %v783_v1, 2  ;;  %902 = vmatpush.msra.mxu3 %v863_v37 }
 0x222   :  { %v762_v15 = vsel %vm1620_vm7, %v716_v10, -1e+30 }
 0x223   :  { %v785_v7 = vmax.f32 %v783_v1, %v784_v28  ;;  %903 = vmatpush.msra.mxu3 %v862_v43 }
 0x225   :  { %v786_v18 = vrot.slane %v785_v7, 1  ;;  %904 = vmatpush.msra.mxu3 %v861_v44 }
 0x227   :  { %v787_v11 = vmax.f32 %v785_v7, %v786_v18  ;;  %v653_v12 = vpop.f32.mrf.mxu1  ;;  %905 = vmatpush.msra.mxu3 %v860_v49 }
 0x228   :  { %v719_v31 = vadd.f32 %v718_v38, %v653_v12 }
 0x229   :  { %v835_v14 = vadd.f32 %v1645_v9, %v787_v11  ;;  %906 = vmatpush.msra.mxu3 %v859_v52 }
 0x22a   :  { %v763_v16 = vsel %vm1624_vm8, %v719_v31, -1e+30 }
 0x22b   :  { %v843_v17 = vmax.f32 %v835_v14, 0.0  ;;  %v788_v19 = vmax.f32 %v762_v15, %v763_v16  ;;  %907 = vmatpush.msra.mxu3 %v858_v57  ;;  %v854_v15 = vld [vmem:[%s1748_s5 + $0x20] sm:$0xff]  ;;  %v853_v16 = vld [vmem:[%s1748_s5 + $0x18] sm:$0xff] }
 0x22d   :  { %v878_v30 = vrot.slane %v843_v17, 7  ;;  %v789_v20 = vrot.slane %v788_v19, 4  ;;  %908 = vmatpush.msra.mxu3 %v857_v61 }
 0x22f   :  { %v790_v22 = vmax.f32 %v788_v19, %v789_v20  ;;  %v656_v23 = vpop.f32.mrf.mxu1  ;;  %v1655_v25 = vsel %vm879_vm9, %v878_v30, %v842_v32  ;;  %909 = vmatpush.msra.mxu3 %v856_v3  ;;  %v852_v30 = vld [vmem:[%s1748_s5 + $0x10] sm:$0xff] }
 0x230   :  { %v722_v27 = vadd.f32 %v721_v39, %v656_v23 }
 0x231   :  { %v791_v40 = vrot.slane %v790_v22, 2 }
 0x232   :  { %v764_v41 = vsel %vm1620_vm7, %v722_v27, -1e+30  ;;  %v850_v27 = vld [vmem:[%s1748_s5] sm:$0xff] }
 0x233   :  { %v792_v26 = vmax.f32 %v790_v22, %v791_v40 }
 0x235   :  { %v793_v38 = vrot.slane %v792_v26, 1 }
 0x237   :  { %v659_v35 = vpop.f32.mrf.mxu1  ;;  %v794_v47 = vmax.f32 %v792_v26, %v793_v38 }
 0x238   :  { %v725_v36 = vadd.f32 %v724_v21, %v659_v35 }
 0x239   :  { %v836_v53 = vadd.f32 %v1645_v9, %v794_v47 }
 0x23a   :  { %v765_v39 = vsel %vm1624_vm8, %v725_v36, -1e+30 }
 0x23b   :  { %v795_v42 = vmax.f32 %v764_v41, %v765_v39  ;;  %v844_v8 = vmax.f32 %v836_v53, 0.0 }
 0x23d   :  { %v796_v46 = vrot.slane %v795_v42, 4  ;;  %v674_v21 = vpop.f32.mrf.mxu3  ;;  %v881_v10 = vrot.slane %v844_v8, 6 }
 0x23e   :  { %v740_v59 = vadd.f32 %v739_v34, %v674_v21 }
 0x23f   :  { %v797_v48 = vmax.f32 %v795_v42, %v796_v46  ;;  %v662_v33 = vpop.f32.mrf.mxu1  ;;  %v883_v22 = vsel %vm882_vm10, %v881_v10, %v1655_v25 }
 0x240   :  { %v728_v62 = vadd.f32 %v1632_v50, %v662_v33  ;;  %v770_v18 = vsel %vm1620_vm7, %v740_v59, -1e+30  ;;  %v855_v50 = vld [vmem:[%s1748_s5 + $0x28] sm:$0xff] }
 0x241   :  { %v798_v51 = vrot.slane %v797_v48, 2  ;;  %910 = vmatpush.msra.mxu3 %v855_v50 }
 0x242   :  { %v766_v11 = vsel %vm1620_vm7, %v728_v62, -1e+30 }
 0x243   :  { %v799_v63 = vmax.f32 %v797_v48, %v798_v51  ;;  %911 = vmatpush.msra.mxu3 %v854_v15 }
 0x245   :  { %v800_v55 = vrot.slane %v799_v63, 1  ;;  %v677_v60 = vpop.f32.mrf.mxu3  ;;  %912 = vmatpush.msra.mxu3 %v853_v16 }
 0x246   :  { %v743_v29 = vadd.f32 %v742_v56, %v677_v60 }
 0x247   :  { %v801_v1 = vmax.f32 %v799_v63, %v800_v55  ;;  %v665_v2 = vpop.f32.mrf.mxu1  ;;  %913 = vmatpush.msra.mxu3 %v852_v30 }
 0x248   :  { %v771_v28 = vsel %vm1624_vm8, %v743_v29, -1e+30  ;;  %v731_v7 = vadd.f32 %v1634_v58, %v665_v2  ;;  %v745_v58 = vpop.f32.mrf.mxu2 }
 0x249   :  { %v837_v6 = vadd.f32 %v1645_v9, %v801_v1  ;;  %v816_v12 = vmax.f32 %v770_v18, %v771_v28  ;;  %914 = vmatpush.msra.mxu3 %v851_v54 }
 0x24a   :  { %v767_v31 = vsel %vm1624_vm8, %v731_v7, -1e+30 }
 0x24b   :  { %v845_v13 = vmax.f32 %v837_v6, 0.0  ;;  %v802_v14 = vmax.f32 %v766_v11, %v767_v31  ;;  %v817_v20 = vrot.slane %v816_v12, 4  ;;  %915 = vmatpush.msra.mxu3 %v850_v27 }
 0x24d   :  { %v884_v17 = vrot.slane %v845_v13, 5  ;;  %v803_v19 = vrot.slane %v802_v14, 4  ;;  %v680_v32 = vpop.f32.mrf.mxu3  ;;  %v818_v34 = vmax.f32 %v816_v12, %v817_v20 }
 0x24e   :  { %v746_v5 = vadd.f32 %v745_v58, %v680_v32 }
 0x24f   :  { %v804_v23 = vmax.f32 %v802_v14, %v803_v19  ;;  %v668_v40 = vpop.f32.mrf.mxu1  ;;  %v886_v26 = vsel %vm885_vm11, %v884_v17, %v883_v22  ;;  %v819_v25 = vrot.slane %v818_v34, 2 }
 0x250   :  { %v748_v36 = vpop.f32.mrf.mxu2  ;;  %v734_v41 = vadd.f32 %v1640_v4, %v668_v40  ;;  %v772_v43 = vsel %vm1620_vm7, %v746_v5, -1e+30 }
 0x251   :  { %v805_v35 = vrot.slane %v804_v23, 2  ;;  %v820_v47 = vmax.f32 %v818_v34, %v819_v25 }
 0x252   :  { %v768_v33 = vsel %vm1620_vm7, %v734_v41, -1e+30 }
 0x253   :  { %v806_v38 = vmax.f32 %v804_v23, %v805_v35  ;;  %v821_v53 = vrot.slane %v820_v47, 1 }
 0x255   :  { %v683_v37 = vpop.f32.mrf.mxu3  ;;  %v807_v48 = vrot.slane %v806_v38, 1 }
 0x256   :  { %v749_v39 = vadd.f32 %v748_v36, %v683_v37 }
 0x257   :  { %v671_v42 = vpop.f32.mrf.mxu1  ;;  %v808_v63 = vmax.f32 %v806_v38, %v807_v48 }
 0x258   :  { %v773_v46 = vsel %vm1624_vm8, %v749_v39, -1e+30  ;;  %v737_v21 = vadd.f32 %v1653_v24, %v671_v42  ;;  %v822_v24 = vmax.f32 %v820_v47, %v821_v53 }
 0x259   :  { %v823_v44 = vmax.f32 %v772_v43, %v773_v46  ;;  %v838_v61 = vadd.f32 %v1645_v9, %v808_v63 }
 0x25a   :  { %v769_v49 = vsel %vm1624_vm8, %v737_v21, -1e+30  ;;  %v840_v0 = vadd.f32 %v1645_v9, %v822_v24 }
 0x25b   :  { %v824_v4 = vrot.slane %v823_v44, 4  ;;  %v809_v56 = vmax.f32 %v768_v33, %v769_v49  ;;  %v846_v1 = vmax.f32 %v838_v61, 0.0 }
 0x25c   :  { %v848_v6 = vmax.f32 %v840_v0, 0.0 }
 0x25d   :  { %v825_v51 = vmax.f32 %v823_v44, %v824_v4  ;;  %v810_v52 = vrot.slane %v809_v56, 4  ;;  %v887_v7 = vrot.slane %v846_v1, 4 }
 0x25e   :  { %v893_v12 = vrot.slane %v848_v6, 2 }
 0x25f   :  { %v826_v57 = vrot.slane %v825_v51, 2  ;;  %v811_v55 = vmax.f32 %v809_v56, %v810_v52  ;;  %v889_v11 = vsel %vm888_vm12, %v887_v7, %v886_v26 }
 0x261   :  { %v827_v59 = vmax.f32 %v825_v51, %v826_v57  ;;  %v812_v60 = vrot.slane %v811_v55, 2 }
 0x263   :  { %v828_v8 = vrot.slane %v827_v59, 1  ;;  %v813_v62 = vmax.f32 %v811_v55, %v812_v60 }
 0x265   :  { %v829_v45 = vmax.f32 %v827_v59, %v828_v8  ;;  %v814_v29 = vrot.slane %v813_v62, 1 }
 0x267   :  { %v815_v2 = vmax.f32 %v813_v62, %v814_v29  ;;  %v841_v3 = vadd.f32 %v1645_v9, %v829_v45 }
 0x269   :  { %v839_v28 = vadd.f32 %v1645_v9, %v815_v2  ;;  %v849_v50 = vmax.f32 %v841_v3, 0.0  ;;  %v1131_v9 = vld [vmem:[%s1747_s6] ss:$0 sm:$0xff] }
 0x26b   :  { %v847_v18 = vmax.f32 %v839_v28, 0.0  ;;  %v896_v58 = vrot.slane %v849_v50, 1 }
 0x26d   :  { %v890_v10 = vrot.slane %v847_v18, 3 }
 0x26f   :  { %v892_v31 = vsel %vm891_vm13, %v890_v10, %v889_v11 }
 0x270   :  { %v895_v13 = vsel %vm894_vm14, %v893_v12, %v892_v31 }
 0x271   :  { %v898_v14 = vsel %vm897_vm15, %v896_v58, %v895_v13 }
 0x272   :  { %916 = vmatmul.f32.vlgmr.msra.gmra.mxu3 %v898_v14 }
 0x2f5   :  { %v917_v15 = vpop.f32.mrf.mxu3 }
 0x2f6   :  { %v918_v16 = vadd.f32 %v1131_v9, %v917_v15 }
 0x2f8   :  { %920 = vst [vmem:[%s1749_s7] sm:$0xff] %v918_v16 }

</bundles_post_ra>
